<compile_context>
chip_gen: v5e
topology: v5e:2x2
jax: 0.10.0
libtpu: 0.0.40
codegen_flags: <defaults>
</compile_context>

<pallas_src>
import functools

import jax
import jax.numpy as jnp
from jax.experimental import pallas as pl
from jax.experimental.pallas import tpu as pltpu


def _focal_loss_kernel(x_ref, t_ref, a_ref, o_ref, *, gamma, hw_valid, tile,
                       has_alpha, needs_mask):
    """One grid step: a (C, TILE) logits block (classes on sublanes, spatial
    on lanes) and a (1, TILE) target block; accumulates the block's loss sum
    into the per-batch (1,1,1) output block (resident across the spatial
    grid axis)."""
    h = pl.program_id(1)

    @pl.when(h == 0)
    def _init():
        o_ref[...] = jnp.zeros_like(o_ref)

    x = x_ref[...].astype(jnp.float32)          # (C, TILE) logits
    t = t_ref[...]                              # (1, TILE) int32 class ids
    c = x.shape[0]

    # Numerically stable log-softmax pieces along the class (sublane) axis.
    m = jnp.max(x, axis=0, keepdims=True)       # (1, TILE)
    z = x - m                                   # (C, TILE)
    se = jnp.sum(jnp.exp(z), axis=0, keepdims=True)
    log_se = jnp.log(se)                        # (1, TILE)

    # One-hot of the target class; shared by the logit gather and the alpha
    # gather (single compare, reductions are over only C sublanes).
    class_ids = jax.lax.broadcasted_iota(jnp.int32, (c, tile), 0)
    onehot = class_ids == t                     # (C, TILE) bool

    z_t = jnp.sum(jnp.where(onehot, z, 0.0), axis=0, keepdims=True)
    logpt = z_t - log_se                        # (1, TILE) = logp[target]
    pt = jnp.exp(logpt)                         # (1, TILE), unscaled (as in torch)

    if has_alpha:
        a_col = a_ref[...].astype(jnp.float32)  # (C, 1)
        at = jnp.sum(jnp.where(onehot, a_col, 0.0), axis=0, keepdims=True)
        scaled_logpt = logpt * at
    else:
        scaled_logpt = logpt                    # alpha=None -> skip entirely

    # Focal factor, specialized on the static gamma.
    if gamma == 0.0:
        loss = -scaled_logpt
    else:
        omp = 1.0 - pt
        gi = int(gamma)
        if float(gi) == gamma and 1 <= gi <= 4:
            f = omp
            for _ in range(gi - 1):             # repeated multiply (VPU) not
                f = f * omp                     # jnp.power (EUP log+exp)
        else:
            f = jnp.power(omp, gamma)
        loss = -f * scaled_logpt                # (1, TILE)

    if needs_mask:
        lane = jax.lax.broadcasted_iota(jnp.int32, (1, tile), 1)
        valid = (h * tile + lane) < hw_valid
        loss = jnp.where(valid, loss, 0.0)

    o_ref[...] += jnp.sum(loss)


def _pick_tile_hw(hw, c, in_itemsize):
    """Spatial (lane) tile: multiple of 128, large enough to amortize
    per-step overhead, small enough that double-buffered input blocks stay
    well inside the most conservative scoped-VMEM default (16 MiB on v5e,
    32 MiB on v6e/v7x)."""
    per_lane_bytes = c * in_itemsize + 4        # logits column + int32 target
    budget = 4 * 1024 * 1024                    # per input buffer (~<=10 MiB total w/ 2x buffering)
    tile = budget // per_lane_bytes
    tile = min(tile, 8192)                      # overhead already amortized
    tile = max(128, (tile // 128) * 128)
    hw_pad128 = ((hw + 127) // 128) * 128
    return min(tile, hw_pad128)


def focal_loss(x, target, *, gamma=0.0, alpha=None, size_average=True):
    """Pallas implementation of FocalLoss.forward.

    x:      (N, C, H, W) logits (NCHW, like the PyTorch module) or (N, C)
    target: (N, H, W) int class indices (or (N,) for 2-D input)
    """
    if x.ndim > 2:
        N, C = x.shape[0], x.shape[1]
        x3 = x.reshape(N, C, -1)                # free: NCHW is already contiguous as (N, C, HW)
        t2 = target.reshape(N, -1).astype(jnp.int32)
    else:
        # (N, C) classification case: rows become the lane ("spatial") dim.
        # TODO(synk): this branch does one small (N,C)->(C,N) copy; fine for
        # classification-sized inputs.
        C = x.shape[1]
        x3 = jnp.transpose(x)[None]             # (1, C, N)
        t2 = target.reshape(1, -1).astype(jnp.int32)

    nb = x3.shape[0]
    hw = x3.shape[2]
    num_rows = nb * hw                          # == number of per-row losses

    tile = _pick_tile_hw(hw, C, x3.dtype.itemsize)
    hw_pad = ((hw + tile - 1) // tile) * tile
    needs_mask = hw_pad != hw
    if needs_mask:
        x3 = jnp.pad(x3, ((0, 0), (0, 0), (0, hw_pad - hw)))
        t2 = jnp.pad(t2, ((0, 0), (0, hw_pad - hw)))
    t3 = t2.reshape(nb, 1, hw_pad)

    if alpha is None:
        alpha_col = jnp.ones((C, 1), jnp.float32)    # unused by the kernel
    else:
        alpha_col = jnp.asarray(alpha, jnp.float32).reshape(C, 1)

    num_tiles = hw_pad // tile
    grid = (nb, num_tiles)

    kernel = functools.partial(
        _focal_loss_kernel,
        gamma=float(gamma),
        hw_valid=hw,
        tile=tile,
        has_alpha=alpha is not None,
        needs_mask=needs_mask,
    )

    partials = pl.pallas_call(
        kernel,
        out_shape=jax.ShapeDtypeStruct((nb, 1, 1), jnp.float32),
        grid_spec=pltpu.PrefetchScalarGridSpec(
            num_scalar_prefetch=0,
            grid=grid,
            in_specs=[
                # logits: batch squeezed, classes on sublanes, spatial on lanes
                pl.BlockSpec((None, C, tile), lambda n, h: (n, 0, h)),
                # targets: (1, TILE), lane-dense int32
                pl.BlockSpec((None, 1, tile), lambda n, h: (n, 0, h)),
                # alpha: tiny (C, 1) column, shared across the grid
                pl.BlockSpec((C, 1), lambda n, h: (0, 0)),
            ],
            # one resident (1,1,1) partial-sum block per batch element
            out_specs=pl.BlockSpec((1, 1, 1), lambda n, h: (n, 0, 0)),
        ),
        compiler_params=pltpu.CompilerParams(
            dimension_semantics=("parallel", "arbitrary"),
            vmem_limit_bytes=32 * 1024 * 1024,
        ),
    )(x3, t3, alpha_col)

    total = jnp.sum(partials)
    if size_average:
        return total / jnp.float32(num_rows)
    return total


def _focal_loss_ref(x, target, *, gamma=0.0, alpha=None, size_average=True):
    """Pure-JAX reference mirroring the PyTorch forward."""
    if x.ndim > 2:
        N, C = x.shape[0], x.shape[1]
        x = jnp.transpose(x.reshape(N, C, -1), (0, 2, 1)).reshape(-1, C)
    t = target.reshape(-1)
    logp = jax.nn.log_softmax(x.astype(jnp.float32), axis=1)
    logpt = jnp.take_along_axis(logp, t[:, None], axis=1)[:, 0]
    pt = jnp.exp(logpt)
    if alpha is not None:
        logpt = logpt * jnp.asarray(alpha, jnp.float32)[t]
    loss = -1.0 * (1.0 - pt) ** gamma * logpt
    return jnp.mean(loss) if size_average else jnp.sum(loss)


if __name__ == "__main__":
    key = jax.random.PRNGKey(0)
    k1, k2 = jax.random.split(key)

    # Small NCHW shapes consistent with the module's segmentation-style use.
    N, C, H, W = 2, 4, 16, 16
    x = jax.random.normal(k1, (N, C, H, W), dtype=jnp.float32)
    target = jax.random.randint(k2, (N, H, W), 0, C, dtype=jnp.int32)

    gamma = 2.0
    alpha = jnp.array([0.25, 0.75, 0.5, 1.0], dtype=jnp.float32)

    # Case 1: gamma=2, alpha weighting, mean reduction.
    out = focal_loss(x, target, gamma=gamma, alpha=alpha, size_average=True)
    out = jax.block_until_ready(out)
    ref = _focal_loss_ref(x, target, gamma=gamma, alpha=alpha,
                          size_average=True)
    assert jnp.allclose(out, ref, rtol=1e-4, atol=1e-5), (out, ref)

    # Case 2: gamma=0, no alpha, sum reduction.
    out2 = focal_loss(x, target, gamma=0.0, alpha=None, size_average=False)
    out2 = jax.block_until_ready(out2)
    ref2 = _focal_loss_ref(x, target, gamma=0.0, alpha=None,
                           size_average=False)
    assert jnp.allclose(out2, ref2, rtol=1e-4, atol=1e-4), (out2, ref2)

    print("KERNEL_OK")
</pallas_src>

<mosaic_0001>
module attributes {stable_mosaic.version = 11 : i64} {
  func.func @_focal_loss_kernel(%arg0: i32, %arg1: i32, %arg2: memref<1x4x256xf32, #tpu.memory_space<vmem>>, %arg3: memref<1x1x256xi32, #tpu.memory_space<vmem>>, %arg4: memref<4x1xf32, #tpu.memory_space<vmem>>, %arg5: memref<1x1x1xf32, #tpu.memory_space<vmem>>) attributes {dimension_semantics = [#tpu.dimension_semantics<parallel>, #tpu.dimension_semantics<arbitrary>], iteration_bounds = array<i64: 2, 1>, scalar_prefetch = 0 : i64, scratch_operands = 0 : i64, tpu.core_type = #tpu.core_type<tc>, window_params = [{transform_indices = @transform_0, window_bounds = array<i64: 1, 4, 256>}, {transform_indices = @transform_1, window_bounds = array<i64: 1, 1, 256>}, {pipeline_mode = #tpu.pipeline_mode<synchronous>, transform_indices = @transform_2, window_bounds = array<i64: 4, 1>}, {transform_indices = @transform_3, window_bounds = array<i64: 1, 1, 1>}]} {
    %c0_i32 = arith.constant 0 : i32
    %0 = arith.cmpi eq, %arg1, %c0_i32 : i32
    %1 = arith.extui %0 : i1 to i32
    %c0_i32_0 = arith.constant 0 : i32
    %2 = arith.cmpi ne, %1, %c0_i32_0 : i32
    scf.if %2 {
      %cst_22 = arith.constant 0.000000e+00 : f32
      %46 = vector.broadcast %cst_22 : f32 to vector<1x1x1xf32>
      %c0_23 = arith.constant 0 : index
      %c0_24 = arith.constant 0 : index
      %c0_25 = arith.constant 0 : index
      %47 = vector.load %arg5[%c0_23, %c0_24, %c0_25] : memref<1x1x1xf32, #tpu.memory_space<vmem>>, vector<1x1x1xf32>
      tpu.vector_store %arg5[%c0_23, %c0_24, %c0_25], %46 {strides = array<i32>} : memref<1x1x1xf32, #tpu.memory_space<vmem>>, vector<1x1x1xf32>,
    } else {
    }
    %c0 = arith.constant 0 : index
    %c0_1 = arith.constant 0 : index
    %c0_2 = arith.constant 0 : index
    %3 = vector.load %arg2[%c0, %c0_1, %c0_2] : memref<1x4x256xf32, #tpu.memory_space<vmem>>, vector<1x4x256xf32>
    %4 = vector.shape_cast %3 : vector<1x4x256xf32> to vector<4x256xf32>
    %c0_3 = arith.constant 0 : index
    %c0_4 = arith.constant 0 : index
    %c0_5 = arith.constant 0 : index
    %5 = vector.load %arg3[%c0_3, %c0_4, %c0_5] : memref<1x1x256xi32, #tpu.memory_space<vmem>>, vector<1x1x256xi32>
    %6 = vector.shape_cast %5 : vector<1x1x256xi32> to vector<1x256xi32>
    %cst = arith.constant dense<0xFF800000> : vector<256xf32>
    %7 = vector.multi_reduction <maximumf>, %4, %cst [0] : vector<4x256xf32> to vector<256xf32>
    %8 = vector.shape_cast %7 : vector<256xf32> to vector<1x256xf32>
    %9 = vector.broadcast %8 : vector<1x256xf32> to vector<4x256xf32>
    %10 = arith.subf %4, %9 : vector<4x256xf32>
    %11 = math.exp %10 : vector<4x256xf32>
    %cst_6 = arith.constant dense<0.000000e+00> : vector<256xf32>
    %12 = vector.multi_reduction <add>, %11, %cst_6 [0] : vector<4x256xf32> to vector<256xf32>
    %13 = vector.shape_cast %12 : vector<256xf32> to vector<1x256xf32>
    %14 = math.log %13 : vector<1x256xf32>
    %15 = tpu.iota {dimensions = array<i32: 0>} : vector<4x256xi32>
    %16 = vector.broadcast %6 : vector<1x256xi32> to vector<4x256xi32>
    %17 = arith.cmpi eq, %15, %16 : vector<4x256xi32>
    %cst_7 = arith.constant 0.000000e+00 : f32
    %18 = vector.broadcast %cst_7 : f32 to vector<4x256xf32>
    %19 = arith.select %17, %10, %18 : vector<4x256xi1>, vector<4x256xf32>
    %cst_8 = arith.constant dense<0.000000e+00> : vector<256xf32>
    %20 = vector.multi_reduction <add>, %19, %cst_8 [0] : vector<4x256xf32> to vector<256xf32>
    %21 = vector.shape_cast %20 : vector<256xf32> to vector<1x256xf32>
    %22 = arith.subf %21, %14 : vector<1x256xf32>
    %23 = math.exp %22 : vector<1x256xf32>
    %c0_9 = arith.constant 0 : index
    %c0_10 = arith.constant 0 : index
    %24 = vector.load %arg4[%c0_9, %c0_10] : memref<4x1xf32, #tpu.memory_space<vmem>>, vector<4x1xf32>
    %cst_11 = arith.constant 0.000000e+00 : f32
    %25 = vector.shape_cast %24 : vector<4x1xf32> to vector<4x1xf32>
    %26 = vector.broadcast %25 : vector<4x1xf32> to vector<4x256xf32>
    %27 = vector.broadcast %cst_11 : f32 to vector<4x256xf32>
    %28 = arith.select %17, %26, %27 : vector<4x256xi1>, vector<4x256xf32>
    %cst_12 = arith.constant dense<0.000000e+00> : vector<256xf32>
    %29 = vector.multi_reduction <add>, %28, %cst_12 [0] : vector<4x256xf32> to vector<256xf32>
    %30 = vector.shape_cast %29 : vector<256xf32> to vector<1x256xf32>
    %31 = arith.mulf %22, %30 : vector<1x256xf32>
    %cst_13 = arith.constant 1.000000e+00 : f32
    %32 = vector.broadcast %cst_13 : f32 to vector<1x256xf32>
    %33 = arith.subf %32, %23 : vector<1x256xf32>
    %34 = arith.mulf %33, %33 : vector<1x256xf32>
    %cst_14 = arith.constant 0.000000e+00 : f32
    %35 = vector.broadcast %cst_14 : f32 to vector<1x256xf32>
    %36 = arith.subf %35, %34 : vector<1x256xf32>
    %37 = arith.mulf %36, %31 : vector<1x256xf32>
    %c0_15 = arith.constant 0 : index
    %c0_16 = arith.constant 0 : index
    %c0_17 = arith.constant 0 : index
    %38 = vector.load %arg5[%c0_15, %c0_16, %c0_17] : memref<1x1x1xf32, #tpu.memory_space<vmem>>, vector<1x1x1xf32>
    %39 = vector.shape_cast %37 : vector<1x256xf32> to vector<1x1x256xf32>
    %cst_18 = arith.constant dense<0.000000e+00> : vector<1xf32>
    %40 = vector.multi_reduction <add>, %39, %cst_18 [1, 2] : vector<1x1x256xf32> to vector<1xf32>
    %41 = vector.shape_cast %40 : vector<1xf32> to vector<1x1x1xf32>
    %42 = vector.extract %41[0, 0, 0] : f32 from vector<1x1x1xf32>
    %43 = vector.broadcast %42 : f32 to vector<1x1x1xf32>
    %44 = arith.addf %38, %43 : vector<1x1x1xf32>
    %c0_19 = arith.constant 0 : index
    %c0_20 = arith.constant 0 : index
    %c0_21 = arith.constant 0 : index
    %45 = vector.load %arg5[%c0_19, %c0_20, %c0_21] : memref<1x1x1xf32, #tpu.memory_space<vmem>>, vector<1x1x1xf32>
    tpu.vector_store %arg5[%c0_19, %c0_20, %c0_21], %44 {strides = array<i32>} : memref<1x1x1xf32, #tpu.memory_space<vmem>>, vector<1x1x1xf32>,
    return
  }
  func.func @transform_0(%arg0: i32, %arg1: i32) -> (i32, i32, i32) {
    %c0_i32 = arith.constant 0 : i32
    %c0_i32_0 = arith.constant 0 : i32
    return %arg0, %c0_i32, %arg1 : i32, i32, i32
  }
  func.func @transform_1(%arg0: i32, %arg1: i32) -> (i32, i32, i32) {
    %c0_i32 = arith.constant 0 : i32
    %c0_i32_0 = arith.constant 0 : i32
    return %arg0, %c0_i32, %arg1 : i32, i32, i32
  }
  func.func @transform_2(%arg0: i32, %arg1: i32) -> (i32, i32) {
    %c0_i32 = arith.constant 0 : i32
    %c0_i32_0 = arith.constant 0 : i32
    %c0_i32_1 = arith.constant 0 : i32
    return %c0_i32, %c0_i32_0 : i32, i32
  }
  func.func @transform_3(%arg0: i32, %arg1: i32) -> (i32, i32, i32) {
    %c0_i32 = arith.constant 0 : i32
    %c0_i32_0 = arith.constant 0 : i32
    %c0_i32_1 = arith.constant 0 : i32
    return %arg0, %c0_i32, %c0_i32_0 : i32, i32, i32
  }
}

</mosaic_0001>

<bundles_post_ra>
// kernel: tpu_custom_call.1
= control target key start
LH: loop header
LB: loop body
LE: loop exit
PB: predicated region body
PF: predicated region fallthrough
CT: control target
= control target key end

     0   :  { %8 = vsyncpa [#allocation3], 0  ;;  %s777_s0 = inlined_call_operand.hbm [shape: f32[2,4,256], index: 0, kind: input, shape index: {}]   ;;  %s778_s1 = inlined_call_operand.vmem [shape: s32[2,1,256], index: 1, kind: input, shape index: {}]   ;;  %s779_s2 = inlined_call_operand.vmem [shape: f32[4,1], index: 2, kind: input, shape index: {}]   ;;  %s780_s3 = inlined_call_operand.vmem [shape: f32[2,1,1], index: 3, kind: output, shape index: {}]  }
   0x1   :  { %10 = vsyncpa [#allocation3 + $0x1], 0  ;;  %s654_s12 = smov 0   ;;  %s656_s13 = smov 0  }
   0x2   :  { %s658_s14 = smov 0   ;;  %s660_s15 = smov 0  }
   0x3   :  { %s662_s16 = smov 0   ;;  %s664_s17 = smov 0  }
   0x4 LB: > { %s467_s18 = sadd.s32 4294967295, %s630_s17   ;;  %s28_s19 = sadd.s32 1, %s626_s16  ;;  %s630_s17 = sphi %s664_s17, %s16_s17   ;;  %s626_s16 = sphi %s662_s16, %s791_s16   ;;  %s622_s15 = sphi %s660_s15, %s790_s15   ;;  %s618_s14 = sphi %s658_s14, %s789_s14   ;;  %s614_s13 = sphi %s656_s13, %s788_s13   ;;  %s610_s12 = sphi %s654_s12, %s787_s12  }
   0x5   : > { %p30_p0 = scmp.ge.s32.totalorder %s28_s19, 2  ;;  %s37_s20 = sadd.s32 1, %s618_s14 }
   0x6   : > { %p44_p1 = scmp.ne.s32.totalorder %s618_s14, %s614_s13  ;;  %p45_p2 = scmp.eq.s32.totalorder %s630_s17, 0 }
   0x7   : > { %s793_s19 = smov (%p30_p0, %s28_s19), 0  ;;  %p50_p4 = scmp.ne.s32.totalorder %s614_s13, %s610_s12 }
   0x8   : > { %p690_p3 = por %p45_p2, %p44_p1  ;;  %s32_s22 = ssub.s32 %s626_s16, %s793_s19 }
   0x9   : > { %p51_p5 = scmp.eq.s32.totalorder %s467_s18, 0  ;;  %p35_p6 = scmp.eq.s32.totalorder %s32_s22, 0 }
   0xa   : > { %p488_p8 = scmp.lt.s32.totalorder %s630_s17, 2  ;;  %s152_s25 = sand.u32 1, %s618_s14  }
   0xb   : > { %p697_p7 = por %p51_p5, %p50_p4  ;;  %s479_s26 = sshll.u32 %s626_s16, 3 }
   0xc   : > { %s703_s24 = scalar_select %p35_p6, %s618_s14, %s37_s20  }
   0xd   : > { %s471_s27 = sshll.u32 %s152_s25, 3  ;;  %s163_s30 = scalar_lea.hbm %s777_s0, %s479_s26 }
   0xe   : > { %s165_s4 = sshll.u32 %s163_s30, 4  ;;  %s156_s5 = scalar_lea.vmem [#allocation2], %s471_s27  ;;  %s166_s4 = int_to_ptr.hbm [resolvable:$true] %s165_s4 }
   0xf   : > { %s167_s6 = sshll.u32 %s156_s5, 4  ;;  %p485_p9 = pnand %p488_p8, %p690_p3  ;;  %s168_s6 = int_to_ptr.vmem [resolvable:$true] %s167_s6 }
  0x10   : > { %p474_p10 = scmp.ge.s32.totalorder %s630_s17, 1  ;;  %p184_p11 = scmp.lt.s32.totalorder %s630_s17, 3 }
  0x11   : > { %s153_s7 = scalar_lea.sflag [#allocation3], %s152_s25 }
  0x12   : > { %487 = dma.hbm_to_vmem [thread:$0]  (!%p485_p9), %s166_s4, 128, %s168_s6, %s153_s7  }
  0x13   : > { %p185_p12 = pnand %p474_p10, %p184_p11 }
  0x14   : > { %s190_s8 = sand.u32 (!%p185_p12), 1, %s614_s13  }
  0x15   : > { %188 = sbr.rel (%p185_p12) target bundleno = 347 (0x15b), region = 32  ;;  %s475_s9 = sshll.u32 (!%p185_p12), %s190_s8, 3 }
  0x16   : > { %s191_s10 = scalar_lea.sflag (!%p185_p12), [#allocation3], %s190_s8  ;;  %s194_s11 = scalar_lea.vmem (!%p185_p12), [#allocation2], %s475_s9 }
  0x1a   : > { %605 = dma.done.wait (%p697_p7), %s191_s10, 128  }
  0x1b   : > { %607 = vsyncadd (%p697_p7), %s191_s10, 4294967168  ;;  %v632_v0 = vmov 0   ;;  %v332_v1 = vld [vmem:[%s779_s2] sm:$0xf]  ;;  %v243_v2 = vld [vmem:[%s194_s11] sm:$0xff]  ;;  %vm251_vm0 = vcmask 1043456   ;;  %v298_v26 = vlaneseq }
  0x1c   : > { %539 = vset.pattern.permute.xlu0 %v632_v0  ;;  %246 = vst [vmem:[#allocation1] ss:$2 sm:$0xff] %v243_v2  ;;  %p226_p13 = scmp.lt.s32.totalorder %s622_s15, 1  ;;  %vm365_vm3 = vcmask 1040384   ;;  %vm241_vm4 = vcmask 0  }
  0x1d   : > { %335 = vperm.xlu0 %539, %v332_v1   ;;  %v299_v29 = vshrl.u32 %v298_v26, 7 }
  0x1e   : > { %s795_s15 = smov (!%p226_p13, %s622_s15), 1 }
  0x1f   : > { %s476_s20 = sshll.u32 %s795_s15, 1  ;;  %s236_s27 = scalar_lea.vmem %s780_s3, %s795_s15 }
  0x20   : > { %s232_s23 = scalar_lea.vmem %s778_s1, %s476_s20 }
  0x21   : > { %v244_v30 = vld [vmem:[%s232_s23] sm:$0x3] }
  0x22   : > { %v300_v32 = vperm.slane %v244_v30, 0  ;;  %v301_v33 = vperm.slane %v244_v30, 1 }
  0x23   : > { %v248_v3 = vld.sshfl [vmem:[#allocation1 + $0x8] sm:$0xff pattern:$0x75316420]  ;;  %v247_v5 = vld.sshfl [vmem:[#allocation1] sm:$0xff pattern:$0x75316420] }
  0x24   : > { %v259_v4 = vsel %vm251_vm0, %v248_v3, -inf  ;;  %v252_v7 = vsel %vm251_vm0, %v247_v5, -inf  ;;  %vm735_vm1 = vcmp.eq.s32.totalorder %v299_v29, %v300_v32  ;;  %vm739_vm2 = vcmp.eq.s32.totalorder %v299_v29, %v301_v33 }
  0x25   : > { %v260_v6 = vrot.slane %v259_v4, 4  ;;  %v253_v8 = vrot.slane %v252_v7, 4 }
  0x27   : > { %v261_v9 = vmax.f32 %v259_v4, %v260_v6  ;;  %v254_v10 = vmax.f32 %v252_v7, %v253_v8 }
  0x29   : > { %v262_v11 = vrot.slane %v261_v9, 2  ;;  %v255_v12 = vrot.slane %v254_v10, 2 }
  0x2b   : > { %v263_v13 = vmax.f32 %v261_v9, %v262_v11  ;;  %v256_v14 = vmax.f32 %v254_v10, %v255_v12 }
  0x2d   : > { %v264_v15 = vrot.slane %v263_v13, 1  ;;  %v257_v16 = vrot.slane %v256_v14, 1 }
  0x2f   : > { %v265_v17 = vmax.f32 %v263_v13, %v264_v15  ;;  %v258_v18 = vmax.f32 %v256_v14, %v257_v16 }
  0x31   : > { %v268_v19 = vrot.slane %v265_v17, 4 }
  0x33   : > { %v269_v20 = vsel %vm251_vm0, %v258_v18, %v268_v19 }
  0x34   : > { %v271_v21 = vsub.f32 %v243_v2, %v269_v20 }
  0x36   : > { %v272_v22 = vmul.f32 1.442695, %v271_v21 }
  0x38   : > { %540 = vpow2.f32 %v272_v22 }
  0x3e   : > { %v541_v23 = vpop.eup %540 }
  0x3f   : > { %275 = vst [vmem:[#allocation1] ss:$2 sm:$0xff] %v541_v23 }
  0x46   : > { %v276_v24 = vld.sshfl [vmem:[#allocation1] sm:$0xff pattern:$0x75316420]  ;;  %v277_v25 = vld.sshfl [vmem:[#allocation1 + $0x8] sm:$0xff pattern:$0x75316420] }
  0x47   : > { %305 = vst [vmem:[#allocation1] ss:$2 sm:$0xff] %v271_v21  ;;  %v280_v27 = vsel %vm251_vm0, %v276_v24, 0.0  ;;  %v287_v28 = vsel %vm251_vm0, %v277_v25, 0.0 }
  0x48   : > { %v281_v31 = vrot.slane %v280_v27, 4  ;;  %v288_v34 = vrot.slane %v287_v28, 4 }
  0x4a   : > { %v282_v37 = vadd.f32 %v281_v31, %v280_v27  ;;  %v289_v40 = vadd.f32 %v288_v34, %v287_v28 }
  0x4c   : > { %v283_v43 = vrot.slane %v282_v37, 2  ;;  %v290_v44 = vrot.slane %v289_v40, 2 }
  0x4e   : > { %v306_v36 = vld.sshfl [vmem:[#allocation1] sm:$0xff pattern:$0x75316420]  ;;  %v307_v39 = vld.sshfl [vmem:[#allocation1 + $0x8] sm:$0xff pattern:$0x75316420]  ;;  %v284_v47 = vadd.f32 %v283_v43, %v282_v37  ;;  %v291_v49 = vadd.f32 %v290_v44, %v289_v40 }
  0x4f   : > { %v310_v41 = vsel %vm735_vm1, %v306_v36, 0.0  ;;  %v311_v42 = vsel %vm739_vm2, %v307_v39, 0.0 }
  0x50   : > { %v312_v45 = vsel %vm251_vm0, %v310_v41, 0.0  ;;  %v319_v46 = vsel %vm251_vm0, %v311_v42, 0.0  ;;  %v285_v51 = vrot.slane %v284_v47, 1  ;;  %v292_v53 = vrot.slane %v291_v49, 1 }
  0x51   : > { %v313_v48 = vrot.slane %v312_v45, 4  ;;  %v320_v50 = vrot.slane %v319_v46, 4  ;;  %v633_v41 = vmov 0.0  }
  0x52   : > { %v286_v55 = vadd.f32 %v285_v51, %v284_v47  ;;  %v293_v57 = vadd.f32 %v292_v53, %v291_v49  ;;  %242 = vst.msk [vmem:[%s236_s27] sm:$0x1] %vm241_vm4, %v633_v41 }
  0x53   : > { %v314_v52 = vadd.f32 %v313_v48, %v312_v45  ;;  %v321_v54 = vadd.f32 %v320_v50, %v319_v46 }
  0x54   : > { %542 = vlog2.f32 %v286_v55 }
  0x55   : > { %v315_v56 = vrot.slane %v314_v52, 2  ;;  %v322_v58 = vrot.slane %v321_v54, 2  ;;  %544 = vlog2.f32 %v293_v57 }
  0x57   : > { %v316_v59 = vadd.f32 %v315_v56, %v314_v52  ;;  %v323_v60 = vadd.f32 %v322_v58, %v321_v54 }
  0x59   : > { %v317_v61 = vrot.slane %v316_v59, 1  ;;  %v324_v63 = vrot.slane %v323_v60, 1  ;;  %v364_v49 = vld [vmem:[%s236_s27] sm:$0x1] }
  0x5a   : > { %v543_v62 = vpop.eup %542 }
  0x5b   : > { %v545_v0 = vpop.eup %544  ;;  %v318_v1 = vadd.f32 %v317_v61, %v316_v59  ;;  %v295_v2 = vmul.f32 0.6931472, %v543_v62  ;;  %v325_v3 = vadd.f32 %v324_v63, %v323_v60 }
  0x5c   : > { %v297_v4 = vmul.f32 0.6931472, %v545_v0 }
  0x5d   : > { %v326_v5 = vsub.f32 %v318_v1, %v295_v2 }
  0x5e   : > { %v327_v6 = vsub.f32 %v325_v3, %v297_v4 }
  0x5f   : > { %v328_v7 = vmul.f32 1.442695, %v326_v5 }
  0x60   : > { %v330_v8 = vmul.f32 1.442695, %v327_v6 }
  0x61   : > { %546 = vpow2.f32 %v328_v7 }
  0x62   : > { %548 = vpow2.f32 %v330_v8 }
  0x67   : > { %v547_v10 = vpop.eup %546 }
  0x68   : > { %v549_v13 = vpop.eup %548  ;;  %v356_v20 = vsub.f32 1.0, %v547_v10 }
  0x69   : > { %v357_v21 = vsub.f32 1.0, %v549_v13 }
  0x6a   : > { %v358_v26 = vmul.f32 %v356_v20, %v356_v20 }
  0x6b   : > { %v359_v27 = vmul.f32 %v357_v21, %v357_v21 }
  0x6c   : > { %v360_v32 = vsub.f32 0.0, %v358_v26 }
  0x6d   : > { %v361_v33 = vsub.f32 0.0, %v359_v27 }
  0x8f   : > { %v336_v9 = vpop.permute.xlu0 %335 }
  0x90   : > { %v338_v11 = vsel %vm735_vm1, %v336_v9, 0.0  ;;  %v339_v12 = vsel %vm739_vm2, %v336_v9, 0.0 }
  0x91   : > { %v340_v14 = vsel %vm251_vm0, %v338_v11, 0.0  ;;  %v347_v15 = vsel %vm251_vm0, %v339_v12, 0.0 }
  0x92   : > { %v341_v16 = vrot.slane %v340_v14, 4  ;;  %v348_v17 = vrot.slane %v347_v15, 4 }
  0x94   : > { %v342_v18 = vadd.f32 %v341_v16, %v340_v14  ;;  %v349_v19 = vadd.f32 %v348_v17, %v347_v15 }
  0x96   : > { %v343_v22 = vrot.slane %v342_v18, 2  ;;  %v350_v23 = vrot.slane %v349_v19, 2 }
  0x98   : > { %v344_v24 = vadd.f32 %v343_v22, %v342_v18  ;;  %v351_v25 = vadd.f32 %v350_v23, %v349_v19 }
  0x9a   : > { %v345_v28 = vrot.slane %v344_v24, 1  ;;  %v352_v29 = vrot.slane %v351_v25, 1 }
  0x9c   : > { %v346_v30 = vadd.f32 %v345_v28, %v344_v24  ;;  %v353_v31 = vadd.f32 %v352_v29, %v351_v25 }
  0x9e   : > { %v354_v34 = vmul.f32 %v346_v30, %v326_v5  ;;  %v355_v35 = vmul.f32 %v353_v31, %v327_v6 }
  0xa0   : > { %v362_v36 = vmul.f32 %v360_v32, %v354_v34  ;;  %v363_v37 = vmul.f32 %v361_v33, %v355_v35 }
  0xa2   : > { %v366_v38 = vsel %vm365_vm3, %v362_v36, 0.0  ;;  %v367_v39 = vsel %vm365_vm3, %v363_v37, 0.0 }
  0xa3   : > { %v368_v40 = vadd.f32 %v367_v39, %v366_v38 }
  0xa5   : > { %369 = vadd.xlane.f32.xlu0 %v368_v40 }
 0x118   : > { %v370_v42 = vpop.xlane.xlu0 %369 }
 0x119   : > { %v371_v43 = vrot.slane %v370_v42, 4 }
 0x11b   : > { %v372_v44 = vadd.f32 %v371_v43, %v370_v42 }
 0x11d   : > { %v373_v45 = vrot.slane %v372_v44, 2 }
 0x11f   : > { %v374_v46 = vadd.f32 %v373_v45, %v372_v44 }
 0x121   : > { %v375_v47 = vrot.slane %v374_v46, 1 }
 0x123   : > { %v376_v48 = vadd.f32 %v375_v47, %v374_v46 }
 0x125   : > { %480 = vpush %v376_v48 }
 0x156   : > { %s481_s28 = spop %480 }
 0x157   : > { %v378_v50 = vstv %s481_s28 }
 0x158   : > { %v379_v51 = vadd.f32 %v378_v50, %v364_v49 }
 0x15a   : > { %381 = vst.msk [vmem:[%s236_s27] sm:$0x1] %vm241_vm4, %v379_v51 }
 0x15b PF: > { %s16_s17 = sadd.s32 1, %s630_s17   ;;  %s787_s12 = smov %s614_s13 }
 0x15c   : > { %p13_p0 = scmp.ge.s32.totalorder %s16_s17, 4   ;;  %s788_s13 = smov %s618_s14 }
 0x15d   : > { %s789_s14 = smov %s703_s24  ;;  %s790_s15 = smov %s626_s16 }
 0x15e   : > { %s791_s16 = smov %s793_s19  ;;  %15 = sbr.rel (!%p13_p0) target bundleno = 4 (0x4), region = 79 }
 0x163   :  { %399 = vsyncpa [#allocation3], 1 }
 0x164   :  { %401 = vsyncpa [#allocation3 + $0x1], 1 }

</bundles_post_ra>
